<compile_context>
chip_gen: v7x
topology: tpu7x:2x2x1
jax: 0.10.0
libtpu: 0.0.40
codegen_flags: <defaults>
</compile_context>

<pallas_src>
import jax
import jax.numpy as jnp
from jax.experimental import pallas as pl
from jax.experimental.pallas import tpu as pltpu


def _stochastic_depth_kernel(keep_ref, x_ref, o_ref):
    # keep_ref: (TILE_B, 1) per-sample {0,1} mask (already in x.dtype).
    # x_ref / o_ref: (TILE_B, TILE_F) activation tiles.  One broadcast vmul.
    o_ref[...] = x_ref[...] * keep_ref[...]


def stochastic_depth(x, *, drop_rate=0.0, training=True, seed=0):
    """x: (N, C, H, W). Each sample zeroed with probability drop_rate (training only)."""
    if (not training) or drop_rate == 0.0:
        return x

    n, c, h, w = x.shape
    f = c * h * w
    dtype = x.dtype
    itemsize = jnp.dtype(dtype).itemsize

    # Per-sample keep decision, hoisted out of the hot loop (mirrors
    # torch.floor(torch.rand(N,1,1,1) + 1 - drop_rate); no rescale).
    # NOTE: callers must thread a fresh seed per training step.
    rand = jax.random.uniform(jax.random.PRNGKey(seed), (n, 1), dtype=jnp.float32)
    keep = jnp.floor(rand + jnp.float32(1.0 - drop_rate)).astype(dtype)

    # ---- Tile selection (bandwidth-bound: big, aligned, pad-free blocks) ----
    # Rows per block: ~128 bytes of sublanes -> 32 f32 / 64 bf16 / 128 int8,
    # always a multiple of the sublane pack.  If the batch is smaller, take it
    # whole (a block dim equal to the full array dim is layout-exempt).
    target_rows = max(8, 128 // itemsize)
    tile_b = n if n <= target_rows else target_rows

    # Feature elems per block: target ~4 MiB blocks, multiple of 128 lanes.
    target_block_bytes = 4 << 20
    tile_f_target = max(128, (target_block_bytes // (tile_b * itemsize)) // 128 * 128)
    tile_f = f if f <= tile_f_target else tile_f_target

    # Double-buffered in + out blocks (~16 MiB at 4 MiB blocks) + headroom.
    block_bytes = tile_b * tile_f * itemsize
    vmem_limit = min(max(4 * block_bytes + (2 << 20), 16 << 20), 48 << 20)

    flat = x.reshape(n, f)  # contiguous reshape: free metadata change
    grid = (pl.cdiv(n, tile_b), pl.cdiv(f, tile_f))  # f innermost

    out_flat = pl.pallas_call(
        _stochastic_depth_kernel,
        out_shape=jax.ShapeDtypeStruct((n, f), dtype),
        grid=grid,
        in_specs=[
            pl.BlockSpec((tile_b, 1), lambda i, j: (i, 0)),        # keep mask
            pl.BlockSpec((tile_b, tile_f), lambda i, j: (i, j)),   # activations
        ],
        out_specs=pl.BlockSpec((tile_b, tile_f), lambda i, j: (i, j)),
        compiler_params=pltpu.CompilerParams(
            dimension_semantics=("parallel", "parallel"),
            vmem_limit_bytes=int(vmem_limit),
        ),
    )(keep, flat)

    # TODO(synk): for very large donated activations, a scalar-prefetch +
    # pl.ANY manual-DMA variant could skip HBM traffic entirely for kept
    # samples and write zero blocks for dropped ones (~4x less traffic at
    # drop_rate=0.5); not needed at these sizes.
    return out_flat.reshape(n, c, h, w)


if __name__ == "__main__":
    key = jax.random.PRNGKey(0)
    x = jax.random.normal(key, (2, 4, 16, 16), dtype=jnp.float32)

    # Training path with nonzero drop rate exercises the kernel.
    y = stochastic_depth(x, drop_rate=0.5, training=True, seed=1234)
    y = jax.block_until_ready(y)

    # Sanity checks: each sample is either untouched or fully zeroed.
    y_np = jax.device_get(y)
    x_np = jax.device_get(x)
    for b in range(x_np.shape[0]):
        kept = bool((y_np[b] != 0.0).any())
        if kept:
            assert jnp.allclose(y_np[b], x_np[b]), "kept sample must be identity"
        else:
            assert (y_np[b] == 0.0).all(), "dropped sample must be all zeros"

    # Non-tile-aligned shapes exercise the cdiv / clipped-edge-block path.
    x2 = jax.random.normal(jax.random.PRNGKey(1), (3, 5, 7, 9), dtype=jnp.float32)
    y2 = jax.block_until_ready(stochastic_depth(x2, drop_rate=0.3, training=True, seed=7))
    y2_np = jax.device_get(y2)
    x2_np = jax.device_get(x2)
    for b in range(x2_np.shape[0]):
        kept = bool((y2_np[b] != 0.0).any())
        if kept:
            assert jnp.allclose(y2_np[b], x2_np[b]), "kept sample must be identity"
        else:
            assert (y2_np[b] == 0.0).all(), "dropped sample must be all zeros"

    # Eval / drop_rate=0 path is identity (no kernel launch needed).
    y_eval = jax.block_until_ready(stochastic_depth(x, drop_rate=0.5, training=False))
    assert jnp.array_equal(y_eval, x)

    print("KERNEL_OK")
</pallas_src>

<mosaic_0001>
module attributes {stable_mosaic.version = 11 : i64} {
  func.func @_stochastic_depth_kernel(%arg0: i32, %arg1: i32, %arg2: memref<2x1xf32, #tpu.memory_space<vmem>>, %arg3: memref<2x1024xf32, #tpu.memory_space<vmem>>, %arg4: memref<2x1024xf32, #tpu.memory_space<vmem>>) attributes {dimension_semantics = [#tpu.dimension_semantics<parallel>, #tpu.dimension_semantics<parallel>], iteration_bounds = array<i64: 1, 1>, scalar_prefetch = 0 : i64, scratch_operands = 0 : i64, tpu.core_type = #tpu.core_type<tc>, window_params = [{transform_indices = @transform_0, window_bounds = array<i64: 2, 1>}, {transform_indices = @transform_1, window_bounds = array<i64: 2, 1024>}, {transform_indices = @transform_2, window_bounds = array<i64: 2, 1024>}]} {
    %c0 = arith.constant 0 : index
    %c0_0 = arith.constant 0 : index
    %0 = vector.load %arg3[%c0, %c0_0] : memref<2x1024xf32, #tpu.memory_space<vmem>>, vector<2x1024xf32>
    %c0_1 = arith.constant 0 : index
    %c0_2 = arith.constant 0 : index
    %1 = vector.load %arg2[%c0_1, %c0_2] : memref<2x1xf32, #tpu.memory_space<vmem>>, vector<2x1xf32>
    %2 = vector.broadcast %1 : vector<2x1xf32> to vector<2x1024xf32>
    %3 = arith.mulf %0, %2 : vector<2x1024xf32>
    %c0_3 = arith.constant 0 : index
    %c0_4 = arith.constant 0 : index
    %4 = vector.load %arg4[%c0_3, %c0_4] : memref<2x1024xf32, #tpu.memory_space<vmem>>, vector<2x1024xf32>
    tpu.vector_store %arg4[%c0_3, %c0_4], %3 {strides = array<i32>} : memref<2x1024xf32, #tpu.memory_space<vmem>>, vector<2x1024xf32>,
    return
  }
  func.func @transform_0(%arg0: i32, %arg1: i32) -> (i32, i32) {
    %c0_i32 = arith.constant 0 : i32
    %c0_i32_0 = arith.constant 0 : i32
    return %arg0, %c0_i32 : i32, i32
  }
  func.func @transform_1(%arg0: i32, %arg1: i32) -> (i32, i32) {
    %c0_i32 = arith.constant 0 : i32
    return %arg0, %arg1 : i32, i32
  }
  func.func @transform_2(%arg0: i32, %arg1: i32) -> (i32, i32) {
    %c0_i32 = arith.constant 0 : i32
    return %arg0, %arg1 : i32, i32
  }
}

</mosaic_0001>

<bundles_post_ra>
// kernel: tpu_custom_call.1
= control target key start
LH: loop header
LB: loop body
LE: loop exit
PB: predicated region body
PF: predicated region fallthrough
CT: control target
= control target key end

     0   :  { %7 = vsyncpa [#allocation3], 0  ;;  %s157_s0 = inlined_call_operand.vmem [shape: f32[2,1], index: 0, kind: input, shape index: {}]   ;;  %s158_s1 = inlined_call_operand.hbm [shape: f32[2,1024], index: 1, kind: input, shape index: {}]   ;;  %s159_s2 = inlined_call_operand.hbm [shape: f32[2,1024], index: 2, kind: output, shape index: {}]  }
   0x1   :  { %8 = vsyncpa [#allocation4], 0  ;;  %s111_s9 = smov [#allocation2]   ;;  %s63_s13 = scalar_lea.hbm %s158_s1, 256 }
   0x2   :  { %s17_s10 = sshll.u32 %s111_s9, 4  ;;  %p64_p0 = scmp.ne.s32.totalorder %s158_s1, %s63_s13  ;;  %s18_s10 = int_to_ptr.vmem [resolvable:$true] %s17_s10 }
   0x3   :  { %p67_p1 = scmp.lt.u32.totalorder %s63_s13, %s158_s1 }
   0x5   :  { %p69_p2 = pnand %p67_p1, %p64_p0 }
   0x7   :  { %72 = shalt.err (!%p69_p2)
}
   0x8   :  { %s73_s18 = scalar_lea.vmem %s18_s10, 256  ;;  %p78_p4 = scmp.lt.s32.totalorder %s18_s10, %s18_s10 }
   0x9   :  { %p74_p3 = scmp.ne.s32.totalorder %s18_s10, %s73_s18  ;;  %p79_p5 = scmp.lt.s32.totalorder %s73_s18, %s73_s18 }
   0xb   :  { %p80_p6 = por %p79_p5, %p78_p4 }
   0xd   :  { %p81_p7 = pnand %p80_p6, %p74_p3 }
   0xf   :  { %84 = shalt.err (!%p81_p7)
}
  0x10   :  { %20 = dma.hbm_to_vmem [thread:$0]  %s158_s1, 256, %s18_s10, [#allocation3]  }
  0x11   :  { %107 = dma.done.wait [#allocation3], 256  }
  0x12   :  { %108 = vsyncadd [#allocation3], 4294967040  ;;  %v112_v0 = vmov 0   ;;  %v26_v1 = vld [vmem:[%s157_s0] sm:$0x3]  ;;  %v34_v4 = vlaneseq  ;;  %v25_v10 = vld [vmem:[#allocation2 + $0x8] sm:$0xff] }
  0x13   :  { %62 = vset.pattern.permute.xlu0 %v112_v0  ;;  %v113_v2 = vmov 269488144   ;;  %v24_v9 = vld [vmem:[#allocation2] sm:$0xff]  ;;  %s114_s23 = smov [#allocation5]  }
  0x14   :  { %29 = vperm.xlu0 %62, %v26_v1   ;;  %v32_v3 = vunpack.c.l.s4 %v113_v2  ;;  %v35_v6 = vshrl.u32 %v34_v4, 7  ;;  %s49_s1 = sshll.u32 %s114_s23, 4  ;;  %s50_s1 = int_to_ptr.vmem [resolvable:$true] %s49_s1 }
  0x15   :  { %s85_s24 = scalar_lea.vmem %s50_s1, 256  ;;  %p90_p9 = scmp.lt.s32.totalorder %s50_s1, %s50_s1 }
  0x16   :  { %v33_v5 = vunpack.c.0.s8 %v32_v3  ;;  %p86_p8 = scmp.ne.s32.totalorder %s50_s1, %s85_s24  ;;  %p91_p10 = scmp.lt.s32.totalorder %s85_s24, %s85_s24 }
  0x18   :  { %v36_v7 = vsub.s32 %v33_v5, %v35_v6  ;;  %p92_p11 = por %p91_p10, %p90_p9 }
  0x1a   :  { %p93_p12 = pnand %p92_p11, %p86_p8 }
  0x93   :  { %v30_v8 = vpop.permute.xlu0 %29 }
  0x94   :  { %v37_v11 = vrot.slane %v30_v8, %v36_v7 }
  0x96   :  { %v39_v12 = vmul.f32 %v37_v11, %v24_v9  ;;  %v40_v13 = vmul.f32 %v37_v11, %v25_v10 }
  0x98   :  { %41 = vst [vmem:[#allocation5] sm:$0xff] %v39_v12  ;;  %42 = vst [vmem:[#allocation5 + $0x8] sm:$0xff] %v40_v13 }
  0x99   :  { %96 = shalt.err (!%p93_p12)
}
  0x9a   :  { %s97_s26 = scalar_lea.hbm %s159_s2, 256 }
  0x9b   :  { %p98_p13 = scmp.ne.s32.totalorder %s159_s2, %s97_s26  ;;  %p101_p0 = scmp.lt.u32.totalorder %s97_s26, %s159_s2 }
  0x9d   :  { %p103_p1 = pnand %p101_p0, %p98_p13 }
  0x9f   :  { %106 = shalt.err (!%p103_p1)
}
  0xa0   :  { %52 = dma.vmem_to_hbm [thread:$0]  %s50_s1, 256, %s159_s2, [#allocation4]  }
  0xa1   :  { %109 = dma.done.wait [#allocation4], 256  }
  0xa2   :  { %110 = vsyncadd [#allocation4], 4294967040 }
  0xa3   :  { %56 = vsyncpa [#allocation3], 1 }
  0xa4   :  { %57 = vsyncpa [#allocation4], 1 }

</bundles_post_ra>
